<compile_context>
chip_gen: v6e
topology: v6e:2x2x1
jax: 0.10.0
libtpu: 0.0.40
codegen_flags: <defaults>
</compile_context>

<pallas_src>
import jax
import jax.numpy as jnp
from jax.experimental import pallas as pl
from jax.experimental.pallas import tpu as pltpu

EMB_DIM = 64   # embedding_dim
FC1_OUT = 64


def _discriminator_kernel(path0_ref,    # SMEM (B,)  int32  scalar-prefetch: path[:, 0]
                          emb_ref,      # VMEM (V, 1, 64)   embedding table (VMEM-resident)
                          heu_ref,      # VMEM (M, 1)
                          wmat_ref,     # VMEM (3B+3, 64): [Wi]*B,[Wg]*B,[Wo]*B, fc1_w, fc1_b, fc2_w
                          scal_ref,     # SMEM (4,): [b_i, b_g, b_o, fc2_b]
                          out_ref):     # VMEM (1, 1)
    B = path0_ref.shape[0]
    M = heu_ref.shape[0]
    GB = 3 * B

    # SMEM scalar reads first, away from all vector code.
    b_i = scal_ref[0]
    b_g = scal_ref[1]
    b_o = scal_ref[2]
    fc2_b = scal_ref[3]

    # ---- fused embedding gather: dynamic leading-dim rows of the VMEM table ----
    # path ids must be < V; an OOB id would index outside the table block.
    x0 = jnp.concatenate([emb_ref[path0_ref[b]] for b in range(B)], axis=0)   # (B, 64)

    # ---- LSTM step t=0 (h0=c0=0 -> W_hh term and forget gate vanish) ----
    # One fused multiply + one XLU lane-reduce for all three live gates.
    x_rep = jnp.concatenate([x0, x0, x0], axis=0)                             # (3B, 64)
    z = jnp.sum(x_rep * wmat_ref[0:GB, :], axis=-1, keepdims=True)            # (3B, 1)
    z_i = z[0:B] + b_i
    z_g = z[B:2 * B] + b_g
    z_o = z[2 * B:GB] + b_o
    c1 = jax.nn.sigmoid(z_i) * jnp.tanh(z_g)
    h1 = jax.nn.sigmoid(z_o) * jnp.tanh(c1)                                   # (B, 1) == path_features

    # ---- single fc1/relu -> fc2 -> sigmoid -> mean over the concatenated rows ----
    fc1_w = wmat_ref[GB:GB + 1, :]                                            # (1, 64)
    fc1_b = wmat_ref[GB + 1:GB + 2, :]
    fc2_w = wmat_ref[GB + 2:GB + 3, :]
    combined = jnp.concatenate([h1, heu_ref[...]], axis=0)                    # (B+M, 1)
    h = jnp.maximum(combined * fc1_w + fc1_b, 0.0)                            # (B+M, 64)  fc1: Linear(1, 64)
    logits = jnp.sum(h * fc2_w, axis=-1, keepdims=True) + fc2_b               # (B+M, 1)
    total = jnp.sum(jax.nn.sigmoid(logits))
    out_ref[...] = jnp.reshape(total * (1.0 / float(B + M)), (1, 1))


def prepare_params(params, batch_size):
    """One-time parameter re-layout (hoisted out of the per-call path)."""
    emb, wih, whh, b_ih, b_hh, fc1_w, fc1_b, fc2_w, fc2_b = params
    del whh  # h0 == 0 -> the recurrent weight never reaches the t=0 output
    f32 = jnp.float32
    # torch LSTM gate order in weight_ih_l0 is [i, f, g, o] (hidden=1 -> 4 rows);
    # the collapse below is specific to that convention.
    assert wih.shape == (4, EMB_DIM) and b_ih.shape == (4,) and b_hh.shape == (4,)
    wih3 = wih[jnp.array([0, 2, 3]), :].astype(f32)                 # (3, 64) rows [i, g, o]
    w_rep = jnp.repeat(wih3, batch_size, axis=0)                    # (3B, 64): [i]*B,[g]*B,[o]*B
    wmat = jnp.concatenate(
        [w_rep,
         fc1_w.reshape(1, FC1_OUT).astype(f32),                     # fc1.weight is (64, 1)
         fc1_b.reshape(1, FC1_OUT).astype(f32),
         fc2_w.reshape(1, FC1_OUT).astype(f32)],                    # fc2.weight is (1, 64)
        axis=0)                                                     # (3B+3, 64)
    b = (b_ih + b_hh).astype(f32)
    scal = jnp.stack([b[0], b[2], b[3], fc2_b.reshape(())]).astype(f32)   # (4,)
    # (V, 1, 64): dynamic gather index lands on an untiled leading dim.
    emb3 = emb.astype(f32).reshape(emb.shape[0], 1, EMB_DIM)
    return emb3, wmat, scal


@jax.jit
def discriminator_forward(path, heu, emb3, wmat, scal):
    """path: (B, T) int32 node ids; heu: (M, 1) f32. Returns scalar f32."""
    B = path.shape[0]
    M = heu.shape[0]
    V = emb3.shape[0]
    path0 = path[:, 0].astype(jnp.int32)                            # first-token ids only

    grid_spec = pltpu.PrefetchScalarGridSpec(
        num_scalar_prefetch=1,                                      # path0 -> SMEM
        grid=(1,),
        in_specs=[
            pl.BlockSpec((V, 1, EMB_DIM), lambda i, p0: (0, 0, 0)),     # VMEM-resident table
            pl.BlockSpec((M, 1), lambda i, p0: (0, 0)),                 # heu
            pl.BlockSpec((3 * B + 3, EMB_DIM), lambda i, p0: (0, 0)),   # packed weights
            pl.BlockSpec(memory_space=pltpu.MemorySpace.SMEM),          # tiny scalars
        ],
        out_specs=pl.BlockSpec((1, 1), lambda i, p0: (0, 0)),
    )
    out = pl.pallas_call(
        _discriminator_kernel,
        out_shape=jax.ShapeDtypeStruct((1, 1), jnp.float32),
        grid_spec=grid_spec,
        compiler_params=pltpu.CompilerParams(
            dimension_semantics=("arbitrary",)),
    )(path0, emb3, heu, wmat, scal)
    return out[0, 0]


def reference_forward(path, heu, params):
    """Pure-JAX replica of the full PyTorch forward (runs the whole LSTM)."""
    emb, wih, whh, b_ih, b_hh, fc1_w, fc1_b, fc2_w, fc2_b = params
    x = emb[path]                                      # (B, T, 64)
    B, T, _ = x.shape
    h = jnp.zeros((B, 1), jnp.float32)
    c = jnp.zeros((B, 1), jnp.float32)
    outs = []
    for t in range(T):
        gates = x[:, t] @ wih.T + b_ih + h @ whh.T + b_hh   # (B, 4)
        i = jax.nn.sigmoid(gates[:, 0:1])
        f = jax.nn.sigmoid(gates[:, 1:2])
        g = jnp.tanh(gates[:, 2:3])
        o = jax.nn.sigmoid(gates[:, 3:4])
        c = f * c + i * g
        h = o * jnp.tanh(c)
        outs.append(h)
    path_features = outs[0]                            # transpose(0,1)[0]
    combined = jnp.concatenate([path_features, heu], axis=0)[:, None, :]  # (B+M,1,1)
    y = jnp.maximum(combined @ fc1_w.T + fc1_b, 0.0)   # (B+M,1,64)
    z = jax.nn.sigmoid(y @ fc2_w.T + fc2_b)            # (B+M,1,1)
    return z.mean()


if __name__ == "__main__":
    key = jax.random.PRNGKey(0)
    ks = jax.random.split(key, 12)

    # Small, module-consistent shapes.
    num_nodes = 50
    B, T, M = 2, 8, 4

    # Deterministic synthetic parameters (shapes from Discriminator.__init__).
    emb = jax.random.normal(ks[0], (num_nodes + 1, EMB_DIM), jnp.float32)
    wih = jax.random.uniform(ks[1], (4, EMB_DIM), jnp.float32, -1.0, 1.0)   # weight_ih_l0
    whh = jax.random.uniform(ks[2], (4, 1), jnp.float32, -1.0, 1.0)         # weight_hh_l0
    b_ih = jax.random.uniform(ks[3], (4,), jnp.float32, -1.0, 1.0)
    b_hh = jax.random.uniform(ks[4], (4,), jnp.float32, -1.0, 1.0)
    fc1_w = jax.random.uniform(ks[5], (FC1_OUT, 1), jnp.float32, -1.0, 1.0)
    fc1_b = jax.random.uniform(ks[6], (FC1_OUT,), jnp.float32, -1.0, 1.0)
    fc2_w = jax.random.uniform(ks[7], (1, FC1_OUT), jnp.float32, -0.125, 0.125)
    fc2_b = jax.random.uniform(ks[8], (1,), jnp.float32, -0.125, 0.125)
    params = (emb, wih, whh, b_ih, b_hh, fc1_w, fc1_b, fc2_w, fc2_b)

    path = jax.random.randint(ks[9], (B, T), 0, num_nodes + 1, dtype=jnp.int32)
    heu = jax.random.uniform(ks[10], (M, 1), jnp.float32, 0.0, 2.0)

    emb_p, wmat_p, scal_p = prepare_params(params, B)   # one-time re-layout
    out = discriminator_forward(path, heu, emb_p, wmat_p, scal_p)
    out = jax.block_until_ready(out)

    ref = jax.block_until_ready(reference_forward(path, heu, params))
    assert jnp.allclose(out, ref, atol=1e-5, rtol=1e-5), (out, ref)
    print("KERNEL_OK")
</pallas_src>

<mosaic_0001>
module attributes {stable_mosaic.version = 11 : i64} {
  func.func @_discriminator_kernel(%arg0: i32, %arg1: memref<2xi32, #tpu.memory_space<smem>>, %arg2: memref<51x1x64xf32, #tpu.memory_space<vmem>>, %arg3: memref<4x1xf32, #tpu.memory_space<vmem>>, %arg4: memref<9x64xf32, #tpu.memory_space<vmem>>, %arg5: memref<4xf32, #tpu.memory_space<smem>>, %arg6: memref<1x1xf32, #tpu.memory_space<vmem>>) attributes {dimension_semantics = [#tpu.dimension_semantics<arbitrary>], iteration_bounds = array<i64: 1>, scalar_prefetch = 1 : i64, scratch_operands = 0 : i64, tpu.core_type = #tpu.core_type<tc>, window_params = [{pipeline_mode = #tpu.pipeline_mode<synchronous>, transform_indices = @transform_0, window_bounds = array<i64: 51, 1, 64>}, {pipeline_mode = #tpu.pipeline_mode<synchronous>, transform_indices = @transform_1, window_bounds = array<i64: 4, 1>}, {pipeline_mode = #tpu.pipeline_mode<synchronous>, transform_indices = @transform_2, window_bounds = array<i64: 9, 64>}, {transform_indices = @transform_3, window_bounds = array<i64: 4>}, {pipeline_mode = #tpu.pipeline_mode<synchronous>, transform_indices = @transform_4, window_bounds = array<i64: 1, 1>}]} {
    %c0 = arith.constant 0 : index
    %0 = memref.load %arg5[%c0] : memref<4xf32, #tpu.memory_space<smem>>
    %c1 = arith.constant 1 : index
    %1 = memref.load %arg5[%c1] : memref<4xf32, #tpu.memory_space<smem>>
    %c2 = arith.constant 2 : index
    %2 = memref.load %arg5[%c2] : memref<4xf32, #tpu.memory_space<smem>>
    %c3 = arith.constant 3 : index
    %3 = memref.load %arg5[%c3] : memref<4xf32, #tpu.memory_space<smem>>
    %c0_0 = arith.constant 0 : index
    %4 = memref.load %arg1[%c0_0] : memref<2xi32, #tpu.memory_space<smem>>
    %5 = arith.index_cast %4 : i32 to index
    %c0_1 = arith.constant 0 : index
    %c0_2 = arith.constant 0 : index
    %6 = vector.load %arg2[%5, %c0_1, %c0_2] : memref<51x1x64xf32, #tpu.memory_space<vmem>>, vector<1x1x64xf32>
    %7 = vector.shape_cast %6 : vector<1x1x64xf32> to vector<1x64xf32>
    %c1_3 = arith.constant 1 : index
    %8 = memref.load %arg1[%c1_3] : memref<2xi32, #tpu.memory_space<smem>>
    %9 = arith.index_cast %8 : i32 to index
    %c0_4 = arith.constant 0 : index
    %c0_5 = arith.constant 0 : index
    %10 = vector.load %arg2[%9, %c0_4, %c0_5] : memref<51x1x64xf32, #tpu.memory_space<vmem>>, vector<1x1x64xf32>
    %11 = vector.shape_cast %10 : vector<1x1x64xf32> to vector<1x64xf32>
    %12 = tpu.concatenate %7, %11 in 0 : vector<1x64xf32>, vector<1x64xf32> -> vector<2x64xf32>
    %13 = tpu.concatenate %12, %12, %12 in 0 : vector<2x64xf32>, vector<2x64xf32>, vector<2x64xf32> -> vector<6x64xf32>
    %c0_6 = arith.constant 0 : index
    %c0_7 = arith.constant 0 : index
    %14 = vector.load %arg4[%c0_6, %c0_7] : memref<9x64xf32, #tpu.memory_space<vmem>>, vector<6x64xf32>
    %15 = arith.mulf %13, %14 : vector<6x64xf32>
    %cst = arith.constant dense<0.000000e+00> : vector<6xf32>
    %16 = vector.multi_reduction <add>, %15, %cst [1] : vector<6x64xf32> to vector<6xf32>
    %17 = vector.shape_cast %16 : vector<6xf32> to vector<6x1xf32>
    %18 = vector.extract_strided_slice %17 {offsets = [0, 0], sizes = [2, 1], strides = [1, 1]} : vector<6x1xf32> to vector<2x1xf32>
    %19 = vector.broadcast %0 : f32 to vector<2x1xf32>
    %20 = arith.addf %18, %19 : vector<2x1xf32>
    %21 = vector.extract_strided_slice %17 {offsets = [2, 0], sizes = [2, 1], strides = [1, 1]} : vector<6x1xf32> to vector<2x1xf32>
    %22 = vector.broadcast %1 : f32 to vector<2x1xf32>
    %23 = arith.addf %21, %22 : vector<2x1xf32>
    %24 = vector.extract_strided_slice %17 {offsets = [4, 0], sizes = [2, 1], strides = [1, 1]} : vector<6x1xf32> to vector<2x1xf32>
    %25 = vector.broadcast %2 : f32 to vector<2x1xf32>
    %26 = arith.addf %24, %25 : vector<2x1xf32>
    %27 = arith.negf %20 : vector<2x1xf32>
    %28 = math.exp %27 : vector<2x1xf32>
    %cst_8 = arith.constant 1.000000e+00 : f32
    %29 = vector.broadcast %cst_8 : f32 to vector<2x1xf32>
    %30 = arith.addf %29, %28 : vector<2x1xf32>
    %31 = arith.divf %29, %30 : vector<2x1xf32>
    %32 = math.tanh %23 : vector<2x1xf32>
    %33 = arith.mulf %31, %32 : vector<2x1xf32>
    %34 = arith.negf %26 : vector<2x1xf32>
    %35 = math.exp %34 : vector<2x1xf32>
    %cst_9 = arith.constant 1.000000e+00 : f32
    %36 = vector.broadcast %cst_9 : f32 to vector<2x1xf32>
    %37 = arith.addf %36, %35 : vector<2x1xf32>
    %38 = arith.divf %36, %37 : vector<2x1xf32>
    %39 = math.tanh %33 : vector<2x1xf32>
    %40 = arith.mulf %38, %39 : vector<2x1xf32>
    %c6 = arith.constant 6 : index
    %c0_10 = arith.constant 0 : index
    %41 = vector.load %arg4[%c6, %c0_10] : memref<9x64xf32, #tpu.memory_space<vmem>>, vector<1x64xf32>
    %c7 = arith.constant 7 : index
    %c0_11 = arith.constant 0 : index
    %42 = vector.load %arg4[%c7, %c0_11] : memref<9x64xf32, #tpu.memory_space<vmem>>, vector<1x64xf32>
    %c8 = arith.constant 8 : index
    %c0_12 = arith.constant 0 : index
    %43 = vector.load %arg4[%c8, %c0_12] : memref<9x64xf32, #tpu.memory_space<vmem>>, vector<1x64xf32>
    %c0_13 = arith.constant 0 : index
    %c0_14 = arith.constant 0 : index
    %44 = vector.load %arg3[%c0_13, %c0_14] : memref<4x1xf32, #tpu.memory_space<vmem>>, vector<4x1xf32>
    %45 = tpu.concatenate %40, %44 in 0 : vector<2x1xf32>, vector<4x1xf32> -> vector<6x1xf32>
    %46 = vector.broadcast %45 : vector<6x1xf32> to vector<6x64xf32>
    %47 = vector.broadcast %41 : vector<1x64xf32> to vector<6x64xf32>
    %48 = arith.mulf %46, %47 : vector<6x64xf32>
    %49 = vector.broadcast %42 : vector<1x64xf32> to vector<6x64xf32>
    %50 = arith.addf %48, %49 : vector<6x64xf32>
    %cst_15 = arith.constant 0.000000e+00 : f32
    %51 = vector.broadcast %cst_15 : f32 to vector<6x64xf32>
    %52 = arith.maximumf %50, %51 : vector<6x64xf32>
    %53 = vector.broadcast %43 : vector<1x64xf32> to vector<6x64xf32>
    %54 = arith.mulf %52, %53 : vector<6x64xf32>
    %cst_16 = arith.constant dense<0.000000e+00> : vector<6xf32>
    %55 = vector.multi_reduction <add>, %54, %cst_16 [1] : vector<6x64xf32> to vector<6xf32>
    %56 = vector.shape_cast %55 : vector<6xf32> to vector<6x1xf32>
    %57 = vector.broadcast %3 : f32 to vector<6x1xf32>
    %58 = arith.addf %56, %57 : vector<6x1xf32>
    %59 = arith.negf %58 : vector<6x1xf32>
    %60 = math.exp %59 : vector<6x1xf32>
    %cst_17 = arith.constant 1.000000e+00 : f32
    %61 = vector.broadcast %cst_17 : f32 to vector<6x1xf32>
    %62 = arith.addf %61, %60 : vector<6x1xf32>
    %63 = arith.divf %61, %62 : vector<6x1xf32>
    %64 = vector.shape_cast %63 : vector<6x1xf32> to vector<1x6x1xf32>
    %cst_18 = arith.constant dense<0.000000e+00> : vector<1xf32>
    %65 = vector.multi_reduction <add>, %64, %cst_18 [1, 2] : vector<1x6x1xf32> to vector<1xf32>
    %66 = vector.shape_cast %65 : vector<1xf32> to vector<1x1x1xf32>
    %67 = vector.extract %66[0, 0, 0] : f32 from vector<1x1x1xf32>
    %cst_19 = arith.constant 0.166666672 : f32
    %68 = arith.mulf %67, %cst_19 : f32
    %69 = vector.broadcast %68 : f32 to vector<1x1xf32>
    %c0_20 = arith.constant 0 : index
    %c0_21 = arith.constant 0 : index
    %70 = vector.load %arg6[%c0_20, %c0_21] : memref<1x1xf32, #tpu.memory_space<vmem>>, vector<1x1xf32>
    tpu.vector_store %arg6[%c0_20, %c0_21], %69 {strides = array<i32>} : memref<1x1xf32, #tpu.memory_space<vmem>>, vector<1x1xf32>,
    return
  }
  func.func @transform_0(%arg0: i32, %arg1: memref<2xi32, #tpu.memory_space<smem>>) -> (i32, i32, i32) {
    %c0_i32 = arith.constant 0 : i32
    %c0_i32_0 = arith.constant 0 : i32
    %c0_i32_1 = arith.constant 0 : i32
    %c0_i32_2 = arith.constant 0 : i32
    return %c0_i32, %c0_i32_0, %c0_i32_1 : i32, i32, i32
  }
  func.func @transform_1(%arg0: i32, %arg1: memref<2xi32, #tpu.memory_space<smem>>) -> (i32, i32) {
    %c0_i32 = arith.constant 0 : i32
    %c0_i32_0 = arith.constant 0 : i32
    %c0_i32_1 = arith.constant 0 : i32
    return %c0_i32, %c0_i32_0 : i32, i32
  }
  func.func @transform_2(%arg0: i32, %arg1: memref<2xi32, #tpu.memory_space<smem>>) -> (i32, i32) {
    %c0_i32 = arith.constant 0 : i32
    %c0_i32_0 = arith.constant 0 : i32
    %c0_i32_1 = arith.constant 0 : i32
    return %c0_i32, %c0_i32_0 : i32, i32
  }
  func.func @transform_3(%arg0: i32, %arg1: memref<2xi32, #tpu.memory_space<smem>>) -> i32 {
    %c0_i32 = arith.constant 0 : i32
    %c0_i32_0 = arith.constant 0 : i32
    return %c0_i32 : i32
  }
  func.func @transform_4(%arg0: i32, %arg1: memref<2xi32, #tpu.memory_space<smem>>) -> (i32, i32) {
    %c0_i32 = arith.constant 0 : i32
    %c0_i32_0 = arith.constant 0 : i32
    %c0_i32_1 = arith.constant 0 : i32
    return %c0_i32, %c0_i32_0 : i32, i32
  }
}

</mosaic_0001>

<bundles_post_ra>
// kernel: discriminator_forward.1
= control target key start
LH: loop header
LB: loop body
LE: loop exit
PB: predicated region body
PF: predicated region fallthrough
CT: control target
= control target key end

     0   :  { %s400_s0 = inlined_call_operand.vmem [shape: s32[2], index: 0, kind: input, shape index: {}]   ;;  %s401_s1 = inlined_call_operand.hbm [shape: f32[51,1,64], index: 1, kind: input, shape index: {}]   ;;  %s402_s2 = inlined_call_operand.vmem [shape: f32[4,1], index: 2, kind: input, shape index: {}]   ;;  %s403_s3 = inlined_call_operand.hbm [shape: f32[9,64], index: 3, kind: input, shape index: {}]   ;;  %s404_s4 = inlined_call_operand.vmem [shape: f32[4], index: 4, kind: input, shape index: {}]   ;;  %s405_s5 = inlined_call_operand.hbm [shape: f32[1,1], index: 5, kind: output, shape index: {}]  }
   0x1   :  { %s10_s20 = sshll.u32 %s400_s0, 4  ;;  %s11_s20 = int_to_ptr.vmem [resolvable:$true] %s10_s20 }
   0x2   :  { %s244_s21 = scalar_lea.vmem %s11_s20, 16  ;;  %p249_p1 = scmp.lt.s32.totalorder %s11_s20, %s11_s20 }
   0x3   :  { %p245_p0 = scmp.ne.s32.totalorder %s11_s20, %s244_s21  ;;  %p250_p2 = scmp.lt.s32.totalorder %s244_s21, %s244_s21 }
   0x5   :  { %p251_p3 = por %p250_p2, %p249_p1 }
   0x7   :  { %p252_p4 = pnand %p251_p3, %p245_p0 }
   0x9   :  { %255 = shalt.err (!%p252_p4)  }
   0xa   :  { %s338_s22 = smov [#allocation3]  }
   0xb   :  { %13 = dma.vmem_to_smem %s11_s20, 16, %s338_s22, [#allocation2] }
   0xc   :  { %328 = dma.done.wait [#allocation2], 16 }
   0xd   :  { %329 = vsyncadd [#allocation2], 4294967280 }
   0xe   :  { %15 = sfence }
   0xf   :  { %16 = vsyncpa [#allocation5], 0 }
  0x10   :  { %17 = vsyncpa [#allocation9], 0 }
  0x11   :  { %18 = vsyncpa [#allocation7], 0 }
  0x12   :  { %19 = vsyncpa [#allocation6], 0  ;;  %s339_s23 = smov [#allocation4]  }
  0x13   :  { %s25_s24 = sshll.u32 %s339_s23, 4  ;;  %s26_s24 = int_to_ptr.vmem [resolvable:$true] %s25_s24 }
  0x14   :  { %s264_s0 = scalar_lea.vmem %s26_s24, 816  ;;  %s268_s25 = scalar_lea.vmem %s26_s24, 832 }
  0x15   :  { %p265_p5 = scmp.ne.s32.totalorder %s26_s24, %s264_s0  ;;  %p269_p6 = scmp.lt.s32.totalorder %s26_s24, %s26_s24 }
  0x16   :  { %p270_p7 = scmp.lt.s32.totalorder %s268_s25, %s264_s0 }
  0x18   :  { %p271_p8 = por %p270_p7, %p269_p6 }
  0x1a   :  { %p272_p9 = pnand %p271_p8, %p265_p5 }
  0x1c   :  { %275 = shalt.err (!%p272_p9)
}
  0x1d   :  { %s340_s26 = smov 16   ;;  %s341_s27 = smov 1  }
  0x1e   :  { %31 = dma.hbm_to_vmem [thread:$0]  %s401_s1, 816, %s26_s24, [#allocation5], %s340_s26, %s340_s26, %s341_s27  }
  0x1f   :  { %s342_s30 = smov [#allocation8]  }
  0x20   :  { %s39_s6 = sshll.u32 %s342_s30, 4  ;;  %s40_s6 = int_to_ptr.vmem [resolvable:$true] %s39_s6 }
  0x21   :  { %s284_s7 = scalar_lea.vmem %s40_s6, 256  ;;  %p289_p11 = scmp.lt.s32.totalorder %s40_s6, %s40_s6 }
  0x22   :  { %p285_p10 = scmp.ne.s32.totalorder %s40_s6, %s284_s7  ;;  %p290_p12 = scmp.lt.s32.totalorder %s284_s7, %s284_s7 }
  0x24   :  { %p291_p13 = por %p290_p12, %p289_p11 }
  0x26   :  { %p292_p0 = pnand %p291_p13, %p285_p10 }
  0x28   :  { %295 = shalt.err (!%p292_p0)
}
  0x29   :  { %s343_s8 = smov 128   ;;  %s344_s9 = smov 8  }
  0x2a   :  { %45 = dma.hbm_to_vmem [thread:$0]  %s403_s3, 256, %s40_s6, [#allocation9], %s343_s8, %s343_s8, %s344_s9  }
  0x2b   :  { %s52_s1 = sshll.u32 %s404_s4, 4  ;;  %s53_s1 = int_to_ptr.vmem [resolvable:$true] %s52_s1 }
  0x2c   :  { %s296_s14 = scalar_lea.vmem %s53_s1, 16  ;;  %p301_p2 = scmp.lt.s32.totalorder %s53_s1, %s53_s1 }
  0x2d   :  { %p297_p1 = scmp.ne.s32.totalorder %s53_s1, %s296_s14  ;;  %p302_p3 = scmp.lt.s32.totalorder %s296_s14, %s296_s14 }
  0x2f   :  { %p303_p4 = por %p302_p3, %p301_p2 }
  0x31   :  { %p304_p5 = pnand %p303_p4, %p297_p1 }
  0x33   :  { %307 = shalt.err (!%p304_p5)
}
  0x34   :  { %s345_s15 = smov [#allocation10]  }
  0x35   :  { %55 = dma.vmem_to_smem %s53_s1, 16, %s345_s15, [#allocation7]  }
  0x36   :  { %330 = dma.done.wait [#allocation5], 816  }
  0x37   :  { %331 = vsyncadd [#allocation5], 4294966480 }
  0x38   :  { %332 = dma.done.wait [#allocation9], 256  }
  0x39   :  { %333 = vsyncadd [#allocation9], 4294967040 }
  0x3a   :  { %334 = dma.done.wait [#allocation7], 16  }
  0x3b   :  { %335 = vsyncadd [#allocation7], 4294967280 }
  0x3c   :  { %65 = sfence }
  0x3d   :  { %s70_s3 = sld [smem:[#allocation3]]  ;;  %vm82_vm0 = vcmask 1040384   ;;  %vm89_vm1 = vcmask 1041408   ;;  %vm91_vm2 = vcmask 1043456   ;;  %v93_v5 = vld [vmem:[#allocation8] sm:$0x3f] }
  0x3e   :  { %s207_s16 = sld [smem:[#allocation3 + $0x1]]  ;;  %vm95_vm3 = vcmask 521216   ;;  %v346_v10 = vmov 0   ;;  %v130_v29 = vld [vmem:[%s402_s2] sm:$0xf]  ;;  %vm170_vm4 = vcmask 5120  }
  0x3f   :  { %227 = vset.pattern.permute.xlu0 %v346_v10  ;;  %s66_s18 = sld [smem:[#allocation10]]  ;;  %v135_v33 = vrot.slane %v130_v29, 6  ;;  %v211_v36 = vld [vmem:[#allocation8 + $0x6] ss:$0 sm:$0xff]  ;;  %v212_v37 = vld [vmem:[#allocation8 + $0x7] ss:$0 sm:$0xff] }
  0x40   :  { %s205_s19 = sld [smem:[#allocation10 + $0x2]]  ;;  %v213_v41 = vld [vmem:[#allocation8 + $0x8] ss:$0 sm:$0xff]  ;;  %s347_s23 = smov [#allocation11]   ;;  %vm183_vm5 = vcmask 0  }
  0x41   :  { %s204_s20 = sld [smem:[#allocation10 + $0x1]]  ;;  %s191_s24 = sshll.u32 %s347_s23, 4  ;;  %s192_s24 = int_to_ptr.vmem [resolvable:$true] %s191_s24 }
  0x42   :  { %s206_s2 = sld [smem:[#allocation10 + $0x3]]  ;;  %s308_s26 = scalar_lea.vmem %s192_s24, 16 }
  0x43   :  { %s71_s4 = scalar_lea.vmem [#allocation4], %s70_s3  ;;  %p309_p6 = scmp.ne.s32.totalorder %s192_s24, %s308_s26 }
  0x44   :  { %v72_v0 = vld [vmem:[%s71_s4] sm:$0x1]  ;;  %s74_s17 = scalar_lea.vmem [#allocation4], %s207_s16  ;;  %s312_s27 = scalar_lea.vmem %s192_s24, 32 }
  0x45   :  { %v208_v1 = vld [vmem:[%s74_s17] ss:$0 sm:$0xff]  ;;  %v99_v11 = vstv %s66_s18  ;;  %p313_p7 = scmp.lt.s32.totalorder %s192_s24, %s192_s24  ;;  %p314_p8 = scmp.lt.s32.totalorder %s312_s27, %s308_s26 }
  0x46   :  { %v83_v2 = vsel %vm82_vm0, %v72_v0, %v208_v1  ;;  %v103_v15 = vstv %s205_s19 }
  0x47   :  { %v85_v3 = vrot.slane %v83_v2, 6  ;;  %v87_v4 = vrot.slane %v83_v2, 4  ;;  %v101_v16 = vstv %s204_s20  ;;  %p315_p9 = por %p314_p8, %p313_p7 }
  0x48   :  { %v162_v45 = vstv %s206_s2 }
  0x49   :  { %v90_v6 = vsel %vm89_vm1, %v83_v2, %v85_v3  ;;  %p316_p10 = pnand %p315_p9, %p309_p6 }
  0x4a   :  { %v92_v7 = vsel %vm91_vm2, %v90_v6, %v87_v4 }
  0x4b   :  { %v94_v8 = vmul.f32 %v93_v5, %v92_v7 }
  0x4d   :  { %v96_v9 = vsel %vm95_vm3, %v94_v8, 0.0 }
  0x4e   :  { %97 = vadd.xlane.f32.xlu0 %v96_v9 }
  0xd7   :  { %v98_v12 = vpop.xlane.xlu0 %97 }
  0xd8   :  { %v100_v13 = vadd.f32 %v99_v11, %v98_v12  ;;  %v104_v17 = vadd.f32 %v103_v15, %v98_v12  ;;  %v102_v18 = vadd.f32 %v101_v16, %v98_v12 }
  0xda   :  { %v209_v14 = vmul.f32 -1.442695, %v100_v13  ;;  %v210_v19 = vmul.f32 -1.442695, %v104_v17 }
  0xdc   :  { %228 = vpow2.f32 %v209_v14 }
  0xdd   :  { %230 = vtanh.f32 %v102_v18 }
  0xde   :  { %232 = vpow2.f32 %v210_v19 }
  0xe9   :  { %v229_v20 = vpop.eup %228 }
  0xea   :  { %v108_v21 = vadd.f32 1.0, %v229_v20  ;;  %v231_v22 = vpop.eup %230 }
  0xeb   :  { %v233_v23 = vpop.eup %232  ;;  %v113_v24 = vrot.slane %v231_v22, 2 }
  0xec   :  { %234 = vrcp.f32 %v108_v21  ;;  %v119_v27 = vadd.f32 1.0, %v233_v23 }
  0xf9   :  { %v235_v25 = vpop.eup %234 }
  0xfa   :  { %v115_v26 = vmul.f32 %v235_v25, %v113_v24 }
  0xfc   :  { %236 = vtanh.f32 %v115_v26 }
  0xfd   :  { %238 = vrcp.f32 %v119_v27 }
 0x109   :  { %v237_v28 = vpop.eup %236 }
 0x10a   :  { %v124_v30 = vrot.slane %v237_v28, 4  ;;  %v239_v31 = vpop.eup %238 }
 0x10c   :  { %v126_v32 = vmul.f32 %v239_v31, %v124_v30 }
 0x10e   :  { %v132_v34 = vrot.slane %v126_v32, 4 }
 0x110   :  { %v137_v35 = vsel %vm89_vm1, %v132_v34, %v135_v33 }
 0x111   :  { %140 = vperm.xlu0 %227, %v137_v35  }
 0x18c   :  { %v141_v38 = vpop.permute.xlu0 %140 }
 0x18d   :  { %v147_v39 = vmul.f32 %v211_v36, %v141_v38 }
 0x18f   :  { %v152_v40 = vadd.f32 %v212_v37, %v147_v39 }
 0x191   :  { %v153_v42 = vmax.f32 %v152_v40, 0.0 }
 0x193   :  { %v158_v43 = vmul.f32 %v213_v41, %v153_v42 }
 0x195   :  { %v159_v44 = vsel %vm95_vm3, %v158_v43, 0.0 }
 0x196   :  { %160 = vadd.xlane.f32.xlu1 %v159_v44 }
 0x21f   :  { %v161_v46 = vpop.xlane.xlu1 %160 }
 0x220   :  { %v163_v47 = vadd.f32 %v162_v45, %v161_v46 }
 0x222   :  { %v214_v48 = vmul.f32 -1.442695, %v163_v47 }
 0x224   :  { %240 = vpow2.f32 %v214_v48 }
 0x231   :  { %v241_v49 = vpop.eup %240 }
 0x232   :  { %v167_v50 = vadd.f32 1.0, %v241_v49 }
 0x234   :  { %242 = vrcp.f32 %v167_v50 }
 0x241   :  { %v243_v51 = vpop.eup %242 }
 0x242   :  { %v171_v52 = vsel %vm170_vm4, %v243_v51, 0.0 }
 0x243   :  { %172 = vadd.xlane.f32.xlu1 %v171_v52 }
 0x2cc   :  { %v173_v53 = vpop.xlane.xlu1 %172 }
 0x2cd   :  { %v174_v54 = vrot.slane %v173_v53, 4 }
 0x2cf   :  { %v175_v55 = vadd.f32 %v174_v54, %v173_v53 }
 0x2d1   :  { %v176_v56 = vrot.slane %v175_v55, 2 }
 0x2d3   :  { %v177_v57 = vadd.f32 %v176_v56, %v175_v55 }
 0x2d5   :  { %v178_v58 = vrot.slane %v177_v57, 1 }
 0x2d7   :  { %v179_v59 = vadd.f32 %v178_v58, %v177_v57 }
 0x2d9   :  { %215 = vpush %v179_v59 }
 0x30a   :  { %s216_s0 = spop %215 }
 0x30b   :  { %s181_s25 = smul.f32 0.16666667, %s216_s0 }
 0x30d   :  { %v182_v60 = vstv %s181_s25 }
 0x30e   :  { %184 = vst.msk [vmem:[#allocation11] sm:$0x1] %vm183_vm5, %v182_v60 }
 0x30f   :  { %319 = shalt.err (!%p316_p10)
}
 0x310   :  { %194 = dma.vmem_to_hbm [thread:$0]  %s192_s24, 16, %s405_s5, [#allocation6]  }
 0x311   :  { %336 = dma.done.wait [#allocation6], 16  }
 0x312   :  { %337 = vsyncadd [#allocation6], 4294967280 }
 0x313   :  { %198 = vsyncpa [#allocation5], 1 }
 0x314   :  { %199 = vsyncpa [#allocation9], 1 }
 0x315   :  { %200 = vsyncpa [#allocation6], 1 }
 0x316   :  { %201 = vsyncpa [#allocation7], 1 }

</bundles_post_ra>
